<compile_context>
chip_gen: v7x
topology: tpu7x:2x2x1
jax: 0.10.0
libtpu: 0.0.40
codegen_flags: <defaults>
</compile_context>

<pallas_src>
import jax
import jax.numpy as jnp
import numpy as np
from jax.experimental import pallas as pl
from jax.experimental.pallas import tpu as pltpu

EPS = 1e-10
LANES = 128


def _kld_kernel(p_ref, q_ref, out_ref, acc_ref):
    # p_ref, q_ref : (tile_rows, 128) VMEM tiles (batch dim squeezed)
    # out_ref      : (8, 128) per-batch partial-sum tile (lane-dense)
    # acc_ref      : (tile_rows, 128) f32 VMEM vector accumulator
    k = pl.program_id(1)

    @pl.when(k == 0)
    def _():
        acc_ref[...] = jnp.zeros_like(acc_ref)

    p = p_ref[...].astype(jnp.float32) + EPS
    q = q_ref[...].astype(jnp.float32) + EPS
    # One log + one reciprocal-ish divide per element; keep the EUP work minimal.
    acc_ref[...] += p * jnp.log(p / q)

    @pl.when(k == pl.num_programs(1) - 1)
    def _():
        t = acc_ref.shape[0]
        # Fold the (t, 128) accumulator into an (8, 128) tile; the tiny final
        # cross-lane sum happens once per batch in the wrapper.
        out_ref[...] = acc_ref[...].reshape(t // 8, 8, LANES).sum(axis=0)


def kld_div_loss_image_data(input_nchw, target_nchw, *, tile_rows=2048):
    N, C, H, W = target_nchw.shape
    CHW = C * H * W

    # The KL sum is over both H*W and C, so the permute in the PyTorch module
    # does not change the result: flatten directly (no transpose / extra HBM pass).
    p = input_nchw.reshape(N, CHW)
    q = target_nchw.reshape(N, CHW)

    # Lane-dense layout: (N, rows, 128). Tile rows sublane-aligned (mult of 8),
    # ~tile_rows*128*4 B (= 1 MiB at tile_rows=2048) per input tile.
    r_raw = pl.cdiv(CHW, LANES)
    t = min(tile_rows, r_raw)
    t = ((t + 7) // 8) * 8                 # sublane-aligned tile rows
    r = pl.cdiv(r_raw, t) * t              # total rows, padded to multiple of t
    pad = r * LANES - CHW
    if pad:
        # Zero padding is exact here: (0+eps)*log((0+eps)/(0+eps)) == 0.
        p = jnp.pad(p, ((0, 0), (0, pad)))
        q = jnp.pad(q, ((0, 0), (0, pad)))
    p = p.reshape(N, r, LANES)
    q = q.reshape(N, r, LANES)
    n_tiles = r // t

    partial = pl.pallas_call(
        _kld_kernel,
        out_shape=jax.ShapeDtypeStruct((N, 8, LANES), jnp.float32),
        grid_spec=pltpu.PrefetchScalarGridSpec(
            num_scalar_prefetch=0,
            grid=(N, n_tiles),  # reduction axis (row tiles) last
            in_specs=[
                pl.BlockSpec((pl.Squeezed(), t, LANES), lambda b, k: (b, k, 0)),
                pl.BlockSpec((pl.Squeezed(), t, LANES), lambda b, k: (b, k, 0)),
            ],
            out_specs=pl.BlockSpec((pl.Squeezed(), 8, LANES), lambda b, k: (b, 0, 0)),
            scratch_shapes=[pltpu.VMEM((t, LANES), jnp.float32)],
        ),
        compiler_params=pltpu.CompilerParams(
            dimension_semantics=("parallel", "arbitrary"),
            # 2 inputs x 2 pipeline buffers x ~1 MiB + 1 MiB acc << 32 MiB,
            # safe on v5e / v6e / v7x scoped VMEM.
            vmem_limit_bytes=32 * 1024 * 1024,
        ),
    )(p, q)

    # Tiny (N*8*128) final reduction outside the kernel.
    return jnp.sum(partial, axis=(1, 2))


def _reference(input_nchw, target_nchw):
    # Faithful to the PyTorch module (permute + view + eps on both + KL sum).
    N, C, H, W = target_nchw.shape
    p = jnp.transpose(input_nchw, (0, 2, 3, 1)).reshape(N, H * W, C) + EPS
    q = jnp.transpose(target_nchw, (0, 2, 3, 1)).reshape(N, H * W, C) + EPS
    return jnp.sum(p * jnp.log(p / q), axis=(1, 2))


if __name__ == "__main__":
    key = jax.random.PRNGKey(0)
    k1, k2 = jax.random.split(key)

    N, C, H, W = 2, 4, 16, 16
    # Distribution-like inputs (softmax over channels), as KL expects.
    x_logits = jax.random.normal(k1, (N, C, H, W), dtype=jnp.float32)
    t_logits = jax.random.normal(k2, (N, C, H, W), dtype=jnp.float32)
    x = jax.nn.softmax(x_logits, axis=1)
    t = jax.nn.softmax(t_logits, axis=1)

    out = jax.block_until_ready(kld_div_loss_image_data(x, t))
    ref = jax.block_until_ready(_reference(x, t))

    assert out.shape == (N,)
    assert np.allclose(np.asarray(out), np.asarray(ref), rtol=1e-4, atol=1e-4)

    print("KERNEL_OK")
</pallas_src>

<mosaic_0001>
module attributes {stable_mosaic.version = 11 : i64} {
  func.func @_kld_kernel(%arg0: i32, %arg1: i32, %arg2: memref<1x8x128xf32, #tpu.memory_space<vmem>>, %arg3: memref<1x8x128xf32, #tpu.memory_space<vmem>>, %arg4: memref<1x8x128xf32, #tpu.memory_space<vmem>>, %arg5: memref<8x128xf32, #tpu.memory_space<vmem>>) attributes {dimension_semantics = [#tpu.dimension_semantics<parallel>, #tpu.dimension_semantics<arbitrary>], iteration_bounds = array<i64: 2, 1>, scalar_prefetch = 0 : i64, scratch_operands = 1 : i64, tpu.core_type = #tpu.core_type<tc>, window_params = [{transform_indices = @transform_0, window_bounds = array<i64: 1, 8, 128>}, {transform_indices = @transform_1, window_bounds = array<i64: 1, 8, 128>}, {transform_indices = @transform_2, window_bounds = array<i64: 1, 8, 128>}]} {
    %c0_i32 = arith.constant 0 : i32
    %0 = arith.cmpi eq, %arg1, %c0_i32 : i32
    %1 = arith.extui %0 : i1 to i32
    %c0_i32_0 = arith.constant 0 : i32
    %2 = arith.cmpi ne, %1, %c0_i32_0 : i32
    scf.if %2 {
      %cst_13 = arith.constant 0.000000e+00 : f32
      %20 = vector.broadcast %cst_13 : f32 to vector<8x128xf32>
      %c0_14 = arith.constant 0 : index
      %c0_15 = arith.constant 0 : index
      %21 = vector.load %arg5[%c0_14, %c0_15] : memref<8x128xf32, #tpu.memory_space<vmem>>, vector<8x128xf32>
      tpu.vector_store %arg5[%c0_14, %c0_15], %20 {strides = array<i32>} : memref<8x128xf32, #tpu.memory_space<vmem>>, vector<8x128xf32>,
    } else {
    }
    %c0 = arith.constant 0 : index
    %c0_1 = arith.constant 0 : index
    %c0_2 = arith.constant 0 : index
    %3 = vector.load %arg2[%c0, %c0_1, %c0_2] : memref<1x8x128xf32, #tpu.memory_space<vmem>>, vector<1x8x128xf32>
    %4 = vector.shape_cast %3 : vector<1x8x128xf32> to vector<8x128xf32>
    %cst = arith.constant 1.000000e-10 : f32
    %5 = vector.broadcast %cst : f32 to vector<8x128xf32>
    %6 = arith.addf %4, %5 : vector<8x128xf32>
    %c0_3 = arith.constant 0 : index
    %c0_4 = arith.constant 0 : index
    %c0_5 = arith.constant 0 : index
    %7 = vector.load %arg3[%c0_3, %c0_4, %c0_5] : memref<1x8x128xf32, #tpu.memory_space<vmem>>, vector<1x8x128xf32>
    %8 = vector.shape_cast %7 : vector<1x8x128xf32> to vector<8x128xf32>
    %cst_6 = arith.constant 1.000000e-10 : f32
    %9 = vector.broadcast %cst_6 : f32 to vector<8x128xf32>
    %10 = arith.addf %8, %9 : vector<8x128xf32>
    %c0_7 = arith.constant 0 : index
    %c0_8 = arith.constant 0 : index
    %11 = vector.load %arg5[%c0_7, %c0_8] : memref<8x128xf32, #tpu.memory_space<vmem>>, vector<8x128xf32>
    %12 = arith.divf %6, %10 : vector<8x128xf32>
    %13 = math.log %12 : vector<8x128xf32>
    %14 = arith.mulf %6, %13 : vector<8x128xf32>
    %15 = arith.addf %11, %14 : vector<8x128xf32>
    %c0_9 = arith.constant 0 : index
    %c0_10 = arith.constant 0 : index
    %16 = vector.load %arg5[%c0_9, %c0_10] : memref<8x128xf32, #tpu.memory_space<vmem>>, vector<8x128xf32>
    tpu.vector_store %arg5[%c0_9, %c0_10], %15 {strides = array<i32>} : memref<8x128xf32, #tpu.memory_space<vmem>>, vector<8x128xf32>,
    %c0_i32_11 = arith.constant 0 : i32
    %17 = arith.cmpi eq, %arg1, %c0_i32_11 : i32
    %18 = arith.extui %17 : i1 to i32
    %c0_i32_12 = arith.constant 0 : i32
    %19 = arith.cmpi ne, %18, %c0_i32_12 : i32
    scf.if %19 {
      %c0_13 = arith.constant 0 : index
      %c0_14 = arith.constant 0 : index
      %20 = vector.load %arg5[%c0_13, %c0_14] : memref<8x128xf32, #tpu.memory_space<vmem>>, vector<8x128xf32>
      %21 = vector.shape_cast %20 : vector<8x128xf32> to vector<1x8x128xf32>
      %cst_15 = arith.constant dense<0.000000e+00> : vector<8x128xf32>
      %22 = vector.multi_reduction <add>, %21, %cst_15 [0] : vector<1x8x128xf32> to vector<8x128xf32>
      %c0_16 = arith.constant 0 : index
      %c0_17 = arith.constant 0 : index
      %c0_18 = arith.constant 0 : index
      %23 = vector.load %arg4[%c0_16, %c0_17, %c0_18] : memref<1x8x128xf32, #tpu.memory_space<vmem>>, vector<1x8x128xf32>
      %24 = vector.shape_cast %23 : vector<1x8x128xf32> to vector<8x128xf32>
      %25 = vector.shape_cast %22 : vector<8x128xf32> to vector<1x8x128xf32>
      tpu.vector_store %arg4[%c0_16, %c0_17, %c0_18], %25 {strides = array<i32>} : memref<1x8x128xf32, #tpu.memory_space<vmem>>, vector<1x8x128xf32>,
    } else {
    }
    return
  }
  func.func @transform_0(%arg0: i32, %arg1: i32) -> (i32, i32, i32) {
    %c0_i32 = arith.constant 0 : i32
    %c0_i32_0 = arith.constant 0 : i32
    return %arg0, %arg1, %c0_i32 : i32, i32, i32
  }
  func.func @transform_1(%arg0: i32, %arg1: i32) -> (i32, i32, i32) {
    %c0_i32 = arith.constant 0 : i32
    %c0_i32_0 = arith.constant 0 : i32
    return %arg0, %arg1, %c0_i32 : i32, i32, i32
  }
  func.func @transform_2(%arg0: i32, %arg1: i32) -> (i32, i32, i32) {
    %c0_i32 = arith.constant 0 : i32
    %c0_i32_0 = arith.constant 0 : i32
    %c0_i32_1 = arith.constant 0 : i32
    return %arg0, %c0_i32, %c0_i32_0 : i32, i32, i32
  }
}

</mosaic_0001>

<bundles_post_ra>
// kernel: tpu_custom_call.1
= control target key start
LH: loop header
LB: loop body
LE: loop exit
PB: predicated region body
PF: predicated region fallthrough
CT: control target
= control target key end

     0   :  { %7 = vsyncpa [#allocation4], 0  ;;  %s827_s0 = inlined_call_operand.hbm [shape: f32[2,8,128], index: 0, kind: input, shape index: {}]   ;;  %s828_s1 = inlined_call_operand.hbm [shape: f32[2,8,128], index: 1, kind: input, shape index: {}]   ;;  %s829_s2 = inlined_call_operand.hbm [shape: f32[2,8,128], index: 2, kind: output, shape index: {}]  }
   0x1   :  { %9 = vsyncpa [#allocation4 + $0x1], 0 }
   0x2   :  { %10 = vsyncpa [#allocation7], 0 }
   0x3   :  { %12 = vsyncpa [#allocation7 + $0x1], 0 }
   0x4   :  { %13 = vsyncpa [#allocation5], 0 }
   0x5   :  { %15 = vsyncpa [#allocation5 + $0x1], 0  ;;  %s607_s9 = smov 0   ;;  %s609_s10 = smov 0  }
   0x6   :  { %s611_s11 = smov 0   ;;  %s613_s12 = smov 0  }
   0x7   :  { %s615_s13 = smov 0   ;;  %s617_s14 = smov 0  }
   0x8 LB: > { %s354_s15 = sadd.s32 4294967295, %s587_s14   ;;  %s355_s16 = sadd.s32 4294967294, %s587_s14   ;;  %s587_s14 = sphi %s617_s14, %s21_s14   ;;  %s583_s13 = sphi %s615_s13, %s849_s13   ;;  %s579_s12 = sphi %s613_s12, %s848_s12   ;;  %s575_s11 = sphi %s611_s11, %s847_s11   ;;  %s571_s10 = sphi %s609_s10, %s846_s10   ;;  %s567_s9 = sphi %s607_s9, %s845_s9  }
   0x9   : > { %s33_s17 = sadd.s32 1, %s583_s13  ;;  %s42_s18 = sadd.s32 1, %s575_s11 }
   0xa   : > { %p35_p0 = scmp.ge.s32.totalorder %s33_s17, 2  ;;  %p49_p1 = scmp.ne.s32.totalorder %s575_s11, %s571_s10 }
   0xb   : > { %p50_p2 = scmp.eq.s32.totalorder %s587_s14, 0  ;;  %p55_p3 = scmp.ne.s32.totalorder %s571_s10, %s567_s9 }
   0xc   : > { %s851_s17 = smov (%p35_p0, %s33_s17), 0  ;;  %p56_p5 = scmp.eq.s32.totalorder %s354_s15, 0 }
   0xd   : > { %p648_p4 = por %p50_p2, %p49_p1  ;;  %s37_s20 = ssub.s32 %s583_s13, %s851_s17 }
   0xe   : > { %p107_p6 = scmp.eq.s32.totalorder %s354_s15, 1  ;;  %p40_p7 = scmp.eq.s32.totalorder %s37_s20, 0 }
   0xf   : > { %p654_p8 = por %p56_p5, %p55_p3  ;;  %p113_p10 = scmp.eq.s32.totalorder %s355_s16, 1 }
  0x10   : > { %p658_p9 = por %p107_p6, %p49_p1  ;;  %p387_p13 = scmp.lt.s32.totalorder %s587_s14, 2 }
  0x11   : > { %s833_s21 = scalar_select %p654_p8, 1, 0 }
  0x12   : > { %s834_s22 = scalar_select %p658_p9, 1, 0 }
  0x13   : > { %s663_s23 = scalar_select %p40_p7, %s575_s11, %s42_s18  }
  0x14   : > { %p665_p11 = por %p113_p10, %p55_p3  ;;  %s672_s25 = sand.u32 1, %s575_s11  }
  0x15   : > { %s358_s26 = sshll.u32 %s672_s25, 3  ;;  %s359_s27 = sshll.u32 %s583_s13, 7 }
  0x16   : > { %s835_s24 = scalar_select %p665_p11, 1, 0 }
  0x17   : > { %s681_s30 = scalar_lea.hbm %s827_s0, %s359_s27  ;;  %s137_s3 = scalar_lea.vmem [#allocation3], %s358_s26 }
  0x18   : > { %s145_s4 = sshll.u32 %s137_s3, 4  ;;  %p689_p0 = pnand %p387_p13, %p648_p4  ;;  %s685_s4 = int_to_ptr.vmem [resolvable:$true] %s145_s4 }
  0x19   : > { %s134_s6 = scalar_lea.sflag [#allocation4], %s672_s25  ;;  %s441_s7 = scalar_lea.hbm %s681_s30, 128 }
  0x1a   : > { %p442_p3 = scmp.ne.s32.totalorder %s681_s30, %s441_s7  ;;  %p443_p5 = pneg %p689_p0 }
  0x1b   : > { %s446_s16 = scalar_lea.hbm %s827_s0, 256  ;;  %p447_p4 = scmp.lt.u32.totalorder %s681_s30, %s827_s0 }
  0x1c   : > { %p444_p6 = pnand %p443_p5, %p442_p3  ;;  %p448_p10 = scmp.lt.u32.totalorder %s446_s16, %s441_s7 }
  0x1d   : > { %p450_p12 = scmp.lt.u32.totalorder %s441_s7, %s681_s30 }
  0x1e   : > { %p445_p7 = pneg %p444_p6  ;;  %p449_p13 = por %p448_p10, %p447_p4 }
  0x20   : > { %p451_p1 = por %p450_p12, %p449_p13 }
  0x22   : > { %p452_p2 = pnand %p451_p1, %p445_p7 }
  0x24   : > { %455 = shalt.err (!%p452_p2)
}
  0x25   : > { %s456_s20 = scalar_lea.vmem %s685_s4, 128  ;;  %s589_s28 = smov [#allocation3]  }
  0x26   : > { %p457_p3 = scmp.ne.s32.totalorder %s685_s4, %s456_s20  ;;  %s461_s29 = sshll.u32 %s589_s28, 4  ;;  %s462_s29 = int_to_ptr.vmem [resolvable:$false] %s461_s29 }
  0x27   : > { %s463_s3 = scalar_lea.vmem %s462_s29, 256  ;;  %p464_p9 = scmp.lt.s32.totalorder %s685_s4, %s462_s29 }
  0x28   : > { %p459_p6 = pnand %p457_p3, %p443_p5  ;;  %p465_p4 = scmp.lt.s32.totalorder %s463_s3, %s456_s20 }
  0x2a   : > { %p460_p11 = pneg %p459_p6  ;;  %p466_p10 = por %p465_p4, %p464_p9 }
  0x2c   : > { %p467_p12 = pnand %p466_p10, %p460_p11 }
  0x2e   : > { %470 = shalt.err (!%p467_p12)
}
  0x2f   : > { %379 = dma.hbm_to_vmem [thread:$0]  (!%p689_p0), %s681_s30, 128, %s685_s4, %s134_s6  }
  0x30   : > { %p837_p1 = scmp.lt.s32.totalorder %s587_s14, 3  ;;  %p838_p2 = scmp.ge.s32.totalorder %s587_s14, 1 }
  0x31   : > { %s734_s16 = scalar_lea.hbm %s828_s1, %s359_s27  ;;  %s156_s18 = scalar_lea.vmem [#allocation6], %s358_s26 }
  0x32   : > { %p725_p7 = pnand %p838_p2, %p837_p1  ;;  %s164_s19 = sshll.u32 %s156_s18, 4  ;;  %s165_s19 = int_to_ptr.vmem [resolvable:$true] %s164_s19 }
  0x33   : > { %s153_s30 = scalar_lea.sflag [#allocation7], %s672_s25  ;;  %s471_s4 = scalar_lea.hbm %s734_s16, 128 }
  0x34   : > { %s839_s7 = scalar_select %p725_p7, 1, 0 }
  0x35   : > { %p472_p9 = scmp.ne.s32.totalorder %s734_s16, %s471_s4  ;;  %s476_s27 = scalar_lea.hbm %s828_s1, 256 }
  0x36   : > { %p477_p3 = scmp.lt.u32.totalorder %s734_s16, %s828_s1  ;;  %p478_p6 = scmp.lt.u32.totalorder %s476_s27, %s471_s4 }
  0x37   : > { %p474_p11 = pnand %p472_p9, %p443_p5  ;;  %p480_p10 = scmp.lt.u32.totalorder %s471_s4, %s734_s16 }
  0x38   : > { %p479_p4 = por %p478_p6, %p477_p3 }
  0x39   : > { %p475_p13 = pneg %p474_p11 }
  0x3a   : > { %p481_p12 = por %p480_p10, %p479_p4 }
  0x3c   : > { %p482_p1 = pnand %p481_p12, %p475_p13 }
  0x3e   : > { %485 = shalt.err (!%p482_p1)
}
  0x3f   : > { %s486_s25 = scalar_lea.vmem %s165_s19, 128  ;;  %s590_s26 = smov [#allocation6]  }
  0x40   : > { %p487_p2 = scmp.ne.s32.totalorder %s165_s19, %s486_s25  ;;  %s491_s3 = sshll.u32 %s590_s26, 4  ;;  %s492_s3 = int_to_ptr.vmem [resolvable:$false] %s491_s3 }
  0x41   : > { %s493_s8 = scalar_lea.vmem %s492_s3, 256  ;;  %p494_p8 = scmp.lt.s32.totalorder %s165_s19, %s492_s3 }
  0x42   : > { %p489_p9 = pnand %p487_p2, %p443_p5  ;;  %p495_p7 = scmp.lt.s32.totalorder %s493_s8, %s486_s25 }
  0x44   : > { %p490_p11 = pneg %p489_p9  ;;  %p496_p3 = por %p495_p7, %p494_p8 }
  0x46   : > { %p497_p6 = pnand %p496_p3, %p490_p11 }
  0x48   : > { %500 = shalt.err (!%p497_p6)
}
  0x49   : > { %382 = dma.hbm_to_vmem [thread:$0]  (!%p689_p0), %s734_s16, 128, %s165_s19, %s153_s30  }
  0x4a   : > { %p840_p13 = scmp.ne.s32.totalorder %s839_s7, 0 }
  0x4b   : > { %s761_s15 = sand.u32 (!%p840_p13), 1, %s571_s10   ;;  %p841_p5 = scmp.ne.s32.totalorder (!%p840_p13), %s833_s21, 0 }
  0x4c   : > { %173 = sbr.rel (%p840_p13) target bundleno = 131 (0x83), region = 28  ;;  %s363_s18 = sshll.u32 (!%p840_p13), %s761_s15, 3 }
  0x4d   : > { %s176_s4 = scalar_lea.sflag (!%p840_p13), [#allocation4], %s761_s15  ;;  %s179_s6 = scalar_lea.vmem (!%p840_p13), [#allocation3], %s363_s18 }
  0x53   : > { %554 = dma.done.wait (%p841_p5), %s176_s4, 128  }
  0x54   : > { %556 = vsyncadd (%p841_p5), %s176_s4, 4294967168  ;;  %s185_s5 = scalar_lea.sflag [#allocation7], %s761_s15  ;;  %s188_s16 = scalar_lea.vmem [#allocation6], %s363_s18 }
  0x55   : > { %558 = dma.done.wait (%p841_p5), %s185_s5, 128  }
  0x56   : > { %560 = vsyncadd (%p841_p5), %s185_s5, 4294967168  ;;  %v221_v0 = vld [vmem:[%s188_s16] sm:$0xff]  ;;  %v219_v2 = vld [vmem:[%s179_s6] sm:$0xff]  ;;  %s213_s7 = scalar_lea.vmem [#allocation8], %s363_s18  ;;  %s367_s30 = sshll.u32 %s579_s12, 7 }
  0x57   : > { %v222_v1 = vadd.f32 1e-10, %v221_v0  ;;  %v220_v3 = vadd.f32 1e-10, %v219_v2  ;;  %s251_s19 = sshll.u32 %s213_s7, 4  ;;  %s780_s27 = scalar_lea.hbm %s829_s2, %s367_s30  ;;  %s775_s19 = int_to_ptr.vmem [resolvable:$true] %s251_s19 }
  0x58   : > { %s238_s28 = scalar_lea.sflag [#allocation5], %s761_s15  ;;  %s501_s29 = scalar_lea.vmem %s775_s19, 128 }
  0x59   : > { %437 = vrcp.f32 %v222_v1  ;;  %p502_p8 = scmp.ne.s32.totalorder %s775_s19, %s501_s29  ;;  %p842_p0 = scmp.ne.s32.totalorder %s834_s22, 0 }
  0x5a   : > { %s591_s12 = smov [#allocation8]  }
  0x5b   : > { %p503_p7 = pnand %p502_p8, %p842_p0  ;;  %s505_s25 = sshll.u32 %s591_s12, 4  ;;  %s506_s25 = int_to_ptr.vmem [resolvable:$false] %s505_s25 }
  0x5c   : > { %s507_s26 = scalar_lea.vmem %s506_s25, 256  ;;  %p508_p10 = scmp.lt.s32.totalorder %s775_s19, %s506_s25 }
  0x5d   : > { %p504_p4 = pneg %p503_p7  ;;  %p509_p12 = scmp.lt.s32.totalorder %s507_s26, %s501_s29 }
  0x5f   : > { %p510_p1 = por %p509_p12, %p508_p10 }
  0x61   : > { %p511_p2 = pnand %p510_p1, %p504_p4 }
  0x63   : > { %v438_v4 = vpop.eup %437 }
  0x64   : > { %v225_v5 = vmul.f32 %v438_v4, %v220_v3 }
  0x66   : > { %439 = vlog2.f32 %v225_v5 }
  0x70   : > { %v440_v6 = vpop.eup %439 }
  0x71   : > { %v227_v7 = vmul.f32 0.6931472, %v440_v6 }
  0x73   : > { %v228_v8 = vmul.f32 %v227_v7, %v220_v3 }
  0x75   : > { %236 = vst [vmem:[%s213_s7] sm:$0xff] %v228_v8 }
  0x76   : > { %514 = shalt.err (!%p511_p2)
}
  0x77   : > { %s515_s3 = scalar_lea.hbm %s780_s27, 128  ;;  %s519_s18 = scalar_lea.hbm %s829_s2, 256 }
  0x78   : > { %p516_p9 = scmp.ne.s32.totalorder %s780_s27, %s515_s3  ;;  %p520_p6 = scmp.lt.u32.totalorder %s780_s27, %s829_s2 }
  0x79   : > { %p521_p13 = scmp.lt.u32.totalorder %s519_s18, %s515_s3  ;;  %p523_p8 = scmp.lt.u32.totalorder %s515_s3, %s780_s27 }
  0x7a   : > { %p517_p11 = pnand %p516_p9, %p842_p0 }
  0x7b   : > { %p522_p5 = por %p521_p13, %p520_p6 }
  0x7c   : > { %p518_p3 = pneg %p517_p11 }
  0x7d   : > { %p524_p7 = por %p523_p8, %p522_p5 }
  0x7f   : > { %p525_p4 = pnand %p524_p7, %p518_p3 }
  0x81   : > { %528 = shalt.err (!%p525_p4)
}
  0x82   : > { %374 = dma.vmem_to_hbm [thread:$0]  (%p842_p0), %s775_s19, 128, %s780_s27, %s238_s28  }
  0x83 PF: > { %s263_s5 = sand.u32 1, %s567_s9   ;;  %p843_p10 = scmp.ne.s32.totalorder %s835_s24, 0 }
  0x84   : > { %p844_p12 = scmp.ge.s32.totalorder %s587_s14, 2  ;;  %s264_s16 = scalar_lea.sflag [#allocation5], %s263_s5 }
  0x86   : > { %p384_p1 = pnand %p844_p12, %p843_p10 }
  0x88   : > { %562 = dma.done.wait (!%p384_p1), %s264_s16, 128  }
  0x89   : > { %564 = vsyncadd (!%p384_p1), %s264_s16, 4294967168  ;;  %s21_s14 = sadd.s32 1, %s587_s14   ;;  %s845_s9 = smov %s571_s10 }
  0x8a   : > { %p18_p2 = scmp.ge.s32.totalorder %s21_s14, 4   ;;  %s846_s10 = smov %s575_s11 }
  0x8b   : > { %s847_s11 = smov %s663_s23  ;;  %s848_s12 = smov %s583_s13 }
  0x8c   : > { %s849_s13 = smov %s851_s17  ;;  %20 = sbr.rel (!%p18_p2) target bundleno = 8 (0x8), region = 94 }
  0x93   :  { %269 = vsyncpa [#allocation4], 1 }
  0x94   :  { %271 = vsyncpa [#allocation4 + $0x1], 1 }
  0x95   :  { %272 = vsyncpa [#allocation7], 1 }
  0x96   :  { %274 = vsyncpa [#allocation7 + $0x1], 1 }
  0x97   :  { %275 = vsyncpa [#allocation5], 1 }
  0x98   :  { %277 = vsyncpa [#allocation5 + $0x1], 1 }

</bundles_post_ra>
